<compile_context>
chip_gen: v6e
topology: v6e:2x2x1
jax: 0.10.0
libtpu: 0.0.40
codegen_flags: <defaults>
</compile_context>

<pallas_src>
import math
import numpy as np

import jax
import jax.numpy as jnp
from jax import lax
from jax.experimental import pallas as pl
from jax.experimental.pallas import tpu as pltpu

# ----- fixed module hyper-parameters -----
N_HEAD = 4
N_FEAT = 32
D_K = N_FEAT // N_HEAD
FLOAT_MIN = float(np.finfo(np.float32).min)


def _sparse_attention_kernel(q_in, k_in, v_in, mask_in,
                             wq, bq, wk, bk, wv, bv,
                             attn_out, x_out):
    """One batch-block per grid step.

    Blocks:
      q_in            : (B_blk, T1, N_FEAT)    VMEM
      k_in / v_in     : (B_blk, T2, N_FEAT)    VMEM
      mask_in         : (B_blk, 1, T2) int32   VMEM  (1 = keep, 0 = masked)
      wq/wk/wv        : (N_FEAT, N_FEAT)       VMEM  (pre-transposed: x @ W)
      bq/bk/bv        : (1, N_FEAT)            VMEM
      attn_out        : (B_blk, T1, N_HEAD*T2)       (head-major lane layout)
      x_out           : (B_blk, T1, N_FEAT)
    """
    Bb, T1, F = q_in.shape
    T2 = k_in.shape[1]

    # --- fused Q/K/V projections: one (Bb*T, F) @ (F, F) MXU matmul each ---
    q = jnp.dot(q_in[...].reshape(Bb * T1, F), wq[...],
                preferred_element_type=jnp.float32) + bq[...]
    k = jnp.dot(k_in[...].reshape(Bb * T2, F), wk[...],
                preferred_element_type=jnp.float32) + bk[...]
    v = jnp.dot(v_in[...].reshape(Bb * T2, F), wv[...],
                preferred_element_type=jnp.float32) + bv[...]
    q = q.reshape(Bb, T1, F)
    k = k.reshape(Bb, T2, F)
    v = v.reshape(Bb, T2, F)

    inv_sqrt_dk = jnp.float32(1.0 / math.sqrt(D_K))

    # Mask broadcast hoisted once (JAX does not CSE broadcast_in_dim);
    # reused by every head and both masked_fill's.
    masked = jnp.broadcast_to(mask_in[...] == 0, (Bb, T1, T2))

    attn_heads = []
    x_heads = []
    for h in range(N_HEAD):          # static 4-way unroll; matmuls batched over Bb
        lo = h * D_K
        qh = q[:, :, lo:lo + D_K]    # (Bb, T1, D_K)
        kh = k[:, :, lo:lo + D_K]    # (Bb, T2, D_K)
        vh = v[:, :, lo:lo + D_K]    # (Bb, T2, D_K)

        # scores = q @ k^T / sqrt(d_k), batched over the batch-block
        s = jnp.einsum('bqd,bkd->bqk', qh, kh,
                       preferred_element_type=jnp.float32) * inv_sqrt_dk

        # masked_fill(mask, float32_min)
        s = jnp.where(masked, jnp.float32(FLOAT_MIN), s)

        # softmax along time2 (reciprocal goes to the EUP slot)
        m = jnp.max(s, axis=-1, keepdims=True)
        e = jnp.exp(s - m)
        denom = jnp.sum(e, axis=-1, keepdims=True)
        attn = e * pl.reciprocal(denom, approx=False)

        # masked_fill(mask, 0.0)
        attn = jnp.where(masked, jnp.float32(0.0), attn)

        attn_heads.append(attn)                                    # (Bb, T1, T2)
        x_heads.append(jnp.einsum('bqk,bkd->bqd', attn, vh,
                                  preferred_element_type=jnp.float32))

    # --- one full-block (lane-dense) store per output per grid step ---
    attn_out[...] = jnp.concatenate(attn_heads, axis=-1)   # (Bb, T1, H*T2)
    x_out[...] = jnp.concatenate(x_heads, axis=-1)         # (Bb, T1, F)


def sparse_attention(query, key, value, mask, params, *, b_block=None):
    """query/key/value: (B, T, N_FEAT) f32; mask: (B, 1, T2) int32.

    Returns (attn (B, H, T1, T2), x (B, T1, N_FEAT)) like the PyTorch forward.
    """
    B, T1, F = query.shape
    T2 = key.shape[1]
    assert F == N_FEAT

    wq, bq, wk, bk, wv, bv = params

    if b_block is None:
        # Whole batch per step: with T=8, F=32 everything fits VMEM trivially,
        # so collapsing the grid removes per-step pipeline overhead.  For large
        # B pick a divisor >1 steps so the parallel axis shards across cores.
        b_block = B
    assert B % b_block == 0
    grid = (B // b_block,)

    act_spec = lambda T: pl.BlockSpec((b_block, T, N_FEAT), lambda b: (b, 0, 0))
    w_spec = pl.BlockSpec((N_FEAT, N_FEAT), lambda b: (0, 0))
    b_spec = pl.BlockSpec((1, N_FEAT), lambda b: (0, 0))

    out_shapes = (
        # attn in a lane-dense (B, T1, H*T2) layout; reshaped back below.
        jax.ShapeDtypeStruct((B, T1, N_HEAD * T2), jnp.float32),
        jax.ShapeDtypeStruct((B, T1, N_FEAT), jnp.float32),
    )

    attn_flat, x = pl.pallas_call(
        _sparse_attention_kernel,
        out_shape=out_shapes,
        grid=grid,
        in_specs=[
            act_spec(T1),                                          # query
            act_spec(T2),                                          # key
            act_spec(T2),                                          # value
            pl.BlockSpec((b_block, 1, T2), lambda b: (b, 0, 0)),   # mask
            w_spec, b_spec,                                        # wq, bq
            w_spec, b_spec,                                        # wk, bk
            w_spec, b_spec,                                        # wv, bv
        ],
        out_specs=(
            pl.BlockSpec((b_block, T1, N_HEAD * T2), lambda b: (b, 0, 0)),
            pl.BlockSpec((b_block, T1, N_FEAT), lambda b: (b, 0, 0)),
        ),
        compiler_params=pltpu.CompilerParams(
            dimension_semantics=("parallel",)),
    )(query, key, value, mask, wq, bq, wk, bk, wv, bv)

    # Wrapper-side relayout back to the module's (B, H, T1, T2) attention map.
    attn = attn_flat.reshape(B, T1, N_HEAD, T2).transpose(0, 2, 1, 3)
    return attn, x


def _reference(query, key, value, mask, params):
    """Pure-JAX mirror of the PyTorch forward (softmax path, v_trans, scale=None)."""
    wq, bq, wk, bk, wv, bv = params
    B, T1, F = query.shape
    q = query @ wq + bq
    k = key @ wk + bk
    v = value @ wv + bv
    qh = q.reshape(B, T1, N_HEAD, D_K).transpose(0, 2, 1, 3)
    kh = k.reshape(B, -1, N_HEAD, D_K).transpose(0, 2, 1, 3)
    vh = v.reshape(B, -1, N_HEAD, D_K).transpose(0, 2, 1, 3)
    scores = jnp.einsum('bhqd,bhkd->bhqk', qh, kh) / math.sqrt(D_K)
    m = (mask[:, None, :, :] == 0)            # (B,1,1,T2)
    scores = jnp.where(m, FLOAT_MIN, scores)
    attn = jax.nn.softmax(scores, axis=-1)
    attn = jnp.where(m, 0.0, attn)
    x = jnp.einsum('bhqk,bhkd->bhqd', attn, vh)
    x = x.transpose(0, 2, 1, 3).reshape(B, T1, N_HEAD * D_K)
    return attn, x


if __name__ == "__main__":
    B, T1, T2 = 2, 8, 8

    key0 = jax.random.PRNGKey(0)
    ks = jax.random.split(key0, 10)

    # deterministic parameter init (nn.Linear shapes: weight (F,F), bias (F,))
    # weights are stored pre-transposed to (in, out) for x @ W.
    def init_w(k):
        return jax.random.normal(k, (N_FEAT, N_FEAT), jnp.float32) * 0.1

    def init_b(k):
        return jax.random.normal(k, (1, N_FEAT), jnp.float32) * 0.05

    params = (init_w(ks[0]), init_b(ks[1]),     # q
              init_w(ks[2]), init_b(ks[3]),     # k
              init_w(ks[4]), init_b(ks[5]))     # v
    # linear_out exists in the module but is not used in forward(); omitted.

    query = jax.random.normal(ks[6], (B, T1, N_FEAT), jnp.float32)
    key_t = jax.random.normal(ks[7], (B, T2, N_FEAT), jnp.float32)
    value = jax.random.normal(ks[8], (B, T2, N_FEAT), jnp.float32)

    # mask (B, 1, T2): 1 = attend, 0 = masked out
    valid_lens = jnp.array([T2, 5])
    mask = (jnp.arange(T2)[None, None, :] < valid_lens[:, None, None]).astype(jnp.int32)

    attn, x = sparse_attention(query, key_t, value, mask, params)
    jax.block_until_ready((attn, x))

    attn_ref, x_ref = _reference(query, key_t, value, mask, params)
    np.testing.assert_allclose(np.asarray(attn), np.asarray(attn_ref),
                               rtol=1e-5, atol=1e-5)
    np.testing.assert_allclose(np.asarray(x), np.asarray(x_ref),
                               rtol=1e-5, atol=1e-5)

    print("KERNEL_OK")
</pallas_src>

<mosaic_0001>
module attributes {stable_mosaic.version = 11 : i64} {
  func.func @_sparse_attention_kernel(%arg0: i32, %arg1: memref<2x8x32xf32, #tpu.memory_space<vmem>>, %arg2: memref<2x8x32xf32, #tpu.memory_space<vmem>>, %arg3: memref<2x8x32xf32, #tpu.memory_space<vmem>>, %arg4: memref<2x1x8xi32, #tpu.memory_space<vmem>>, %arg5: memref<32x32xf32, #tpu.memory_space<vmem>>, %arg6: memref<1x32xf32, #tpu.memory_space<vmem>>, %arg7: memref<32x32xf32, #tpu.memory_space<vmem>>, %arg8: memref<1x32xf32, #tpu.memory_space<vmem>>, %arg9: memref<32x32xf32, #tpu.memory_space<vmem>>, %arg10: memref<1x32xf32, #tpu.memory_space<vmem>>, %arg11: memref<2x8x32xf32, #tpu.memory_space<vmem>>, %arg12: memref<2x8x32xf32, #tpu.memory_space<vmem>>) attributes {dimension_semantics = [#tpu.dimension_semantics<parallel>], iteration_bounds = array<i64: 1>, scalar_prefetch = 0 : i64, scratch_operands = 0 : i64, tpu.core_type = #tpu.core_type<tc>, window_params = [{transform_indices = @transform_0, window_bounds = array<i64: 2, 8, 32>}, {transform_indices = @transform_1, window_bounds = array<i64: 2, 8, 32>}, {transform_indices = @transform_2, window_bounds = array<i64: 2, 8, 32>}, {transform_indices = @transform_3, window_bounds = array<i64: 2, 1, 8>}, {pipeline_mode = #tpu.pipeline_mode<synchronous>, transform_indices = @transform_4, window_bounds = array<i64: 32, 32>}, {pipeline_mode = #tpu.pipeline_mode<synchronous>, transform_indices = @transform_5, window_bounds = array<i64: 1, 32>}, {pipeline_mode = #tpu.pipeline_mode<synchronous>, transform_indices = @transform_6, window_bounds = array<i64: 32, 32>}, {pipeline_mode = #tpu.pipeline_mode<synchronous>, transform_indices = @transform_7, window_bounds = array<i64: 1, 32>}, {pipeline_mode = #tpu.pipeline_mode<synchronous>, transform_indices = @transform_8, window_bounds = array<i64: 32, 32>}, {pipeline_mode = #tpu.pipeline_mode<synchronous>, transform_indices = @transform_9, window_bounds = array<i64: 1, 32>}, {transform_indices = @transform_10, window_bounds = array<i64: 2, 8, 32>}, {transform_indices = @transform_11, window_bounds = array<i64: 2, 8, 32>}]} {
    %c0 = arith.constant 0 : index
    %c0_0 = arith.constant 0 : index
    %c0_1 = arith.constant 0 : index
    %0 = vector.load %arg1[%c0, %c0_0, %c0_1] : memref<2x8x32xf32, #tpu.memory_space<vmem>>, vector<2x8x32xf32>
    %1 = vector.shape_cast %0 : vector<2x8x32xf32> to vector<16x32xf32>
    %c0_2 = arith.constant 0 : index
    %c0_3 = arith.constant 0 : index
    %2 = vector.load %arg5[%c0_2, %c0_3] : memref<32x32xf32, #tpu.memory_space<vmem>>, vector<32x32xf32>
    %cst = arith.constant dense<0.000000e+00> : vector<16x32xf32>
    %3 = tpu.matmul %1, %2, %cst {dimension_numbers = #tpu.dot_dimension_numbers<[1], [0], [0], [1], [0, 0, 1, 1], [], []>} : vector<16x32xf32>, vector<32x32xf32>, vector<16x32xf32> -> vector<16x32xf32>
    %c0_4 = arith.constant 0 : index
    %c0_5 = arith.constant 0 : index
    %4 = vector.load %arg6[%c0_4, %c0_5] : memref<1x32xf32, #tpu.memory_space<vmem>>, vector<1x32xf32>
    %5 = vector.broadcast %4 : vector<1x32xf32> to vector<16x32xf32>
    %6 = arith.addf %3, %5 : vector<16x32xf32>
    %c0_6 = arith.constant 0 : index
    %c0_7 = arith.constant 0 : index
    %c0_8 = arith.constant 0 : index
    %7 = vector.load %arg2[%c0_6, %c0_7, %c0_8] : memref<2x8x32xf32, #tpu.memory_space<vmem>>, vector<2x8x32xf32>
    %8 = vector.shape_cast %7 : vector<2x8x32xf32> to vector<16x32xf32>
    %c0_9 = arith.constant 0 : index
    %c0_10 = arith.constant 0 : index
    %9 = vector.load %arg7[%c0_9, %c0_10] : memref<32x32xf32, #tpu.memory_space<vmem>>, vector<32x32xf32>
    %cst_11 = arith.constant dense<0.000000e+00> : vector<16x32xf32>
    %10 = tpu.matmul %8, %9, %cst_11 {dimension_numbers = #tpu.dot_dimension_numbers<[1], [0], [0], [1], [0, 0, 1, 1], [], []>} : vector<16x32xf32>, vector<32x32xf32>, vector<16x32xf32> -> vector<16x32xf32>
    %c0_12 = arith.constant 0 : index
    %c0_13 = arith.constant 0 : index
    %11 = vector.load %arg8[%c0_12, %c0_13] : memref<1x32xf32, #tpu.memory_space<vmem>>, vector<1x32xf32>
    %12 = vector.broadcast %11 : vector<1x32xf32> to vector<16x32xf32>
    %13 = arith.addf %10, %12 : vector<16x32xf32>
    %c0_14 = arith.constant 0 : index
    %c0_15 = arith.constant 0 : index
    %c0_16 = arith.constant 0 : index
    %14 = vector.load %arg3[%c0_14, %c0_15, %c0_16] : memref<2x8x32xf32, #tpu.memory_space<vmem>>, vector<2x8x32xf32>
    %15 = vector.shape_cast %14 : vector<2x8x32xf32> to vector<16x32xf32>
    %c0_17 = arith.constant 0 : index
    %c0_18 = arith.constant 0 : index
    %16 = vector.load %arg9[%c0_17, %c0_18] : memref<32x32xf32, #tpu.memory_space<vmem>>, vector<32x32xf32>
    %cst_19 = arith.constant dense<0.000000e+00> : vector<16x32xf32>
    %17 = tpu.matmul %15, %16, %cst_19 {dimension_numbers = #tpu.dot_dimension_numbers<[1], [0], [0], [1], [0, 0, 1, 1], [], []>} : vector<16x32xf32>, vector<32x32xf32>, vector<16x32xf32> -> vector<16x32xf32>
    %c0_20 = arith.constant 0 : index
    %c0_21 = arith.constant 0 : index
    %18 = vector.load %arg10[%c0_20, %c0_21] : memref<1x32xf32, #tpu.memory_space<vmem>>, vector<1x32xf32>
    %19 = vector.broadcast %18 : vector<1x32xf32> to vector<16x32xf32>
    %20 = arith.addf %17, %19 : vector<16x32xf32>
    %21 = vector.shape_cast %6 : vector<16x32xf32> to vector<2x8x32xf32>
    %22 = vector.shape_cast %13 : vector<16x32xf32> to vector<2x8x32xf32>
    %23 = vector.shape_cast %20 : vector<16x32xf32> to vector<2x8x32xf32>
    %c0_22 = arith.constant 0 : index
    %c0_23 = arith.constant 0 : index
    %c0_24 = arith.constant 0 : index
    %24 = vector.load %arg4[%c0_22, %c0_23, %c0_24] : memref<2x1x8xi32, #tpu.memory_space<vmem>>, vector<2x1x8xi32>
    %c0_i32 = arith.constant 0 : i32
    %25 = vector.broadcast %c0_i32 : i32 to vector<2x1x8xi32>
    %26 = arith.cmpi eq, %24, %25 : vector<2x1x8xi32>
    %27 = vector.shape_cast %26 : vector<2x1x8xi1> to vector<2x1x8xi1>
    %28 = vector.broadcast %27 : vector<2x1x8xi1> to vector<2x8x8xi1>
    %29 = vector.extract_strided_slice %21 {offsets = [0, 0, 0], sizes = [2, 8, 8], strides = [1, 1, 1]} : vector<2x8x32xf32> to vector<2x8x8xf32>
    %30 = vector.extract_strided_slice %22 {offsets = [0, 0, 0], sizes = [2, 8, 8], strides = [1, 1, 1]} : vector<2x8x32xf32> to vector<2x8x8xf32>
    %31 = vector.extract_strided_slice %23 {offsets = [0, 0, 0], sizes = [2, 8, 8], strides = [1, 1, 1]} : vector<2x8x32xf32> to vector<2x8x8xf32>
    "tpu.trace_start"() <{level = 10 : i32, message = "bqd,bkd->bqk"}> : () -> ()
    %cst_25 = arith.constant dense<0.000000e+00> : vector<2x8x8xf32>
    %32 = tpu.matmul %29, %30, %cst_25 {dimension_numbers = #tpu.dot_dimension_numbers<[2], [2], [1], [1], [0, 0, 0, 1, 1, 1], [0], [0]>} : vector<2x8x8xf32>, vector<2x8x8xf32>, vector<2x8x8xf32> -> vector<2x8x8xf32>
    "tpu.trace_stop"() : () -> ()
    %cst_26 = arith.constant 0.353553385 : f32
    %33 = vector.broadcast %cst_26 : f32 to vector<2x8x8xf32>
    %34 = arith.mulf %32, %33 : vector<2x8x8xf32>
    %cst_27 = arith.constant -3.40282347E+38 : f32
    %35 = vector.broadcast %cst_27 : f32 to vector<2x8x8xf32>
    %36 = arith.select %28, %35, %34 : vector<2x8x8xi1>, vector<2x8x8xf32>
    %cst_28 = arith.constant dense<0xFF800000> : vector<2x8xf32>
    %37 = vector.multi_reduction <maximumf>, %36, %cst_28 [2] : vector<2x8x8xf32> to vector<2x8xf32>
    %38 = vector.shape_cast %37 : vector<2x8xf32> to vector<2x8x1xf32>
    %39 = vector.broadcast %38 : vector<2x8x1xf32> to vector<2x8x8xf32>
    %40 = arith.subf %36, %39 : vector<2x8x8xf32>
    %41 = math.exp %40 : vector<2x8x8xf32>
    %cst_29 = arith.constant dense<0.000000e+00> : vector<2x8xf32>
    %42 = vector.multi_reduction <add>, %41, %cst_29 [2] : vector<2x8x8xf32> to vector<2x8xf32>
    %43 = vector.shape_cast %42 : vector<2x8xf32> to vector<2x8x1xf32>
    %44 = tpu.reciprocal %43 : vector<2x8x1xf32> -> vector<2x8x1xf32>
    %45 = vector.broadcast %44 : vector<2x8x1xf32> to vector<2x8x8xf32>
    %46 = arith.mulf %41, %45 : vector<2x8x8xf32>
    %cst_30 = arith.constant 0.000000e+00 : f32
    %47 = vector.broadcast %cst_30 : f32 to vector<2x8x8xf32>
    %48 = arith.select %28, %47, %46 : vector<2x8x8xi1>, vector<2x8x8xf32>
    "tpu.trace_start"() <{level = 10 : i32, message = "bqk,bkd->bqd"}> : () -> ()
    %cst_31 = arith.constant dense<0.000000e+00> : vector<2x8x8xf32>
    %49 = tpu.matmul %48, %31, %cst_31 {dimension_numbers = #tpu.dot_dimension_numbers<[2], [1], [1], [2], [0, 0, 0, 1, 1, 2], [0], [0]>} : vector<2x8x8xf32>, vector<2x8x8xf32>, vector<2x8x8xf32> -> vector<2x8x8xf32>
    "tpu.trace_stop"() : () -> ()
    %50 = vector.extract_strided_slice %21 {offsets = [0, 0, 8], sizes = [2, 8, 8], strides = [1, 1, 1]} : vector<2x8x32xf32> to vector<2x8x8xf32>
    %51 = vector.extract_strided_slice %22 {offsets = [0, 0, 8], sizes = [2, 8, 8], strides = [1, 1, 1]} : vector<2x8x32xf32> to vector<2x8x8xf32>
    %52 = vector.extract_strided_slice %23 {offsets = [0, 0, 8], sizes = [2, 8, 8], strides = [1, 1, 1]} : vector<2x8x32xf32> to vector<2x8x8xf32>
    "tpu.trace_start"() <{level = 10 : i32, message = "bqd,bkd->bqk"}> : () -> ()
    %cst_32 = arith.constant dense<0.000000e+00> : vector<2x8x8xf32>
    %53 = tpu.matmul %50, %51, %cst_32 {dimension_numbers = #tpu.dot_dimension_numbers<[2], [2], [1], [1], [0, 0, 0, 1, 1, 1], [0], [0]>} : vector<2x8x8xf32>, vector<2x8x8xf32>, vector<2x8x8xf32> -> vector<2x8x8xf32>
    "tpu.trace_stop"() : () -> ()
    %cst_33 = arith.constant 0.353553385 : f32
    %54 = vector.broadcast %cst_33 : f32 to vector<2x8x8xf32>
    %55 = arith.mulf %53, %54 : vector<2x8x8xf32>
    %cst_34 = arith.constant -3.40282347E+38 : f32
    %56 = vector.broadcast %cst_34 : f32 to vector<2x8x8xf32>
    %57 = arith.select %28, %56, %55 : vector<2x8x8xi1>, vector<2x8x8xf32>
    %cst_35 = arith.constant dense<0xFF800000> : vector<2x8xf32>
    %58 = vector.multi_reduction <maximumf>, %57, %cst_35 [2] : vector<2x8x8xf32> to vector<2x8xf32>
    %59 = vector.shape_cast %58 : vector<2x8xf32> to vector<2x8x1xf32>
    %60 = vector.broadcast %59 : vector<2x8x1xf32> to vector<2x8x8xf32>
    %61 = arith.subf %57, %60 : vector<2x8x8xf32>
    %62 = math.exp %61 : vector<2x8x8xf32>
    %cst_36 = arith.constant dense<0.000000e+00> : vector<2x8xf32>
    %63 = vector.multi_reduction <add>, %62, %cst_36 [2] : vector<2x8x8xf32> to vector<2x8xf32>
    %64 = vector.shape_cast %63 : vector<2x8xf32> to vector<2x8x1xf32>
    %65 = tpu.reciprocal %64 : vector<2x8x1xf32> -> vector<2x8x1xf32>
    %66 = vector.broadcast %65 : vector<2x8x1xf32> to vector<2x8x8xf32>
    %67 = arith.mulf %62, %66 : vector<2x8x8xf32>
    %cst_37 = arith.constant 0.000000e+00 : f32
    %68 = vector.broadcast %cst_37 : f32 to vector<2x8x8xf32>
    %69 = arith.select %28, %68, %67 : vector<2x8x8xi1>, vector<2x8x8xf32>
    "tpu.trace_start"() <{level = 10 : i32, message = "bqk,bkd->bqd"}> : () -> ()
    %cst_38 = arith.constant dense<0.000000e+00> : vector<2x8x8xf32>
    %70 = tpu.matmul %69, %52, %cst_38 {dimension_numbers = #tpu.dot_dimension_numbers<[2], [1], [1], [2], [0, 0, 0, 1, 1, 2], [0], [0]>} : vector<2x8x8xf32>, vector<2x8x8xf32>, vector<2x8x8xf32> -> vector<2x8x8xf32>
    "tpu.trace_stop"() : () -> ()
    %71 = vector.extract_strided_slice %21 {offsets = [0, 0, 16], sizes = [2, 8, 8], strides = [1, 1, 1]} : vector<2x8x32xf32> to vector<2x8x8xf32>
    %72 = vector.extract_strided_slice %22 {offsets = [0, 0, 16], sizes = [2, 8, 8], strides = [1, 1, 1]} : vector<2x8x32xf32> to vector<2x8x8xf32>
    %73 = vector.extract_strided_slice %23 {offsets = [0, 0, 16], sizes = [2, 8, 8], strides = [1, 1, 1]} : vector<2x8x32xf32> to vector<2x8x8xf32>
    "tpu.trace_start"() <{level = 10 : i32, message = "bqd,bkd->bqk"}> : () -> ()
    %cst_39 = arith.constant dense<0.000000e+00> : vector<2x8x8xf32>
    %74 = tpu.matmul %71, %72, %cst_39 {dimension_numbers = #tpu.dot_dimension_numbers<[2], [2], [1], [1], [0, 0, 0, 1, 1, 1], [0], [0]>} : vector<2x8x8xf32>, vector<2x8x8xf32>, vector<2x8x8xf32> -> vector<2x8x8xf32>
    "tpu.trace_stop"() : () -> ()
    %cst_40 = arith.constant 0.353553385 : f32
    %75 = vector.broadcast %cst_40 : f32 to vector<2x8x8xf32>
    %76 = arith.mulf %74, %75 : vector<2x8x8xf32>
    %cst_41 = arith.constant -3.40282347E+38 : f32
    %77 = vector.broadcast %cst_41 : f32 to vector<2x8x8xf32>
    %78 = arith.select %28, %77, %76 : vector<2x8x8xi1>, vector<2x8x8xf32>
    %cst_42 = arith.constant dense<0xFF800000> : vector<2x8xf32>
    %79 = vector.multi_reduction <maximumf>, %78, %cst_42 [2] : vector<2x8x8xf32> to vector<2x8xf32>
    %80 = vector.shape_cast %79 : vector<2x8xf32> to vector<2x8x1xf32>
    %81 = vector.broadcast %80 : vector<2x8x1xf32> to vector<2x8x8xf32>
    %82 = arith.subf %78, %81 : vector<2x8x8xf32>
    %83 = math.exp %82 : vector<2x8x8xf32>
    %cst_43 = arith.constant dense<0.000000e+00> : vector<2x8xf32>
    %84 = vector.multi_reduction <add>, %83, %cst_43 [2] : vector<2x8x8xf32> to vector<2x8xf32>
    %85 = vector.shape_cast %84 : vector<2x8xf32> to vector<2x8x1xf32>
    %86 = tpu.reciprocal %85 : vector<2x8x1xf32> -> vector<2x8x1xf32>
    %87 = vector.broadcast %86 : vector<2x8x1xf32> to vector<2x8x8xf32>
    %88 = arith.mulf %83, %87 : vector<2x8x8xf32>
    %cst_44 = arith.constant 0.000000e+00 : f32
    %89 = vector.broadcast %cst_44 : f32 to vector<2x8x8xf32>
    %90 = arith.select %28, %89, %88 : vector<2x8x8xi1>, vector<2x8x8xf32>
    "tpu.trace_start"() <{level = 10 : i32, message = "bqk,bkd->bqd"}> : () -> ()
    %cst_45 = arith.constant dense<0.000000e+00> : vector<2x8x8xf32>
    %91 = tpu.matmul %90, %73, %cst_45 {dimension_numbers = #tpu.dot_dimension_numbers<[2], [1], [1], [2], [0, 0, 0, 1, 1, 2], [0], [0]>} : vector<2x8x8xf32>, vector<2x8x8xf32>, vector<2x8x8xf32> -> vector<2x8x8xf32>
    "tpu.trace_stop"() : () -> ()
    %92 = vector.extract_strided_slice %21 {offsets = [0, 0, 24], sizes = [2, 8, 8], strides = [1, 1, 1]} : vector<2x8x32xf32> to vector<2x8x8xf32>
    %93 = vector.extract_strided_slice %22 {offsets = [0, 0, 24], sizes = [2, 8, 8], strides = [1, 1, 1]} : vector<2x8x32xf32> to vector<2x8x8xf32>
    %94 = vector.extract_strided_slice %23 {offsets = [0, 0, 24], sizes = [2, 8, 8], strides = [1, 1, 1]} : vector<2x8x32xf32> to vector<2x8x8xf32>
    "tpu.trace_start"() <{level = 10 : i32, message = "bqd,bkd->bqk"}> : () -> ()
    %cst_46 = arith.constant dense<0.000000e+00> : vector<2x8x8xf32>
    %95 = tpu.matmul %92, %93, %cst_46 {dimension_numbers = #tpu.dot_dimension_numbers<[2], [2], [1], [1], [0, 0, 0, 1, 1, 1], [0], [0]>} : vector<2x8x8xf32>, vector<2x8x8xf32>, vector<2x8x8xf32> -> vector<2x8x8xf32>
    "tpu.trace_stop"() : () -> ()
    %cst_47 = arith.constant 0.353553385 : f32
    %96 = vector.broadcast %cst_47 : f32 to vector<2x8x8xf32>
    %97 = arith.mulf %95, %96 : vector<2x8x8xf32>
    %cst_48 = arith.constant -3.40282347E+38 : f32
    %98 = vector.broadcast %cst_48 : f32 to vector<2x8x8xf32>
    %99 = arith.select %28, %98, %97 : vector<2x8x8xi1>, vector<2x8x8xf32>
    %cst_49 = arith.constant dense<0xFF800000> : vector<2x8xf32>
    %100 = vector.multi_reduction <maximumf>, %99, %cst_49 [2] : vector<2x8x8xf32> to vector<2x8xf32>
    %101 = vector.shape_cast %100 : vector<2x8xf32> to vector<2x8x1xf32>
    %102 = vector.broadcast %101 : vector<2x8x1xf32> to vector<2x8x8xf32>
    %103 = arith.subf %99, %102 : vector<2x8x8xf32>
    %104 = math.exp %103 : vector<2x8x8xf32>
    %cst_50 = arith.constant dense<0.000000e+00> : vector<2x8xf32>
    %105 = vector.multi_reduction <add>, %104, %cst_50 [2] : vector<2x8x8xf32> to vector<2x8xf32>
    %106 = vector.shape_cast %105 : vector<2x8xf32> to vector<2x8x1xf32>
    %107 = tpu.reciprocal %106 : vector<2x8x1xf32> -> vector<2x8x1xf32>
    %108 = vector.broadcast %107 : vector<2x8x1xf32> to vector<2x8x8xf32>
    %109 = arith.mulf %104, %108 : vector<2x8x8xf32>
    %cst_51 = arith.constant 0.000000e+00 : f32
    %110 = vector.broadcast %cst_51 : f32 to vector<2x8x8xf32>
    %111 = arith.select %28, %110, %109 : vector<2x8x8xi1>, vector<2x8x8xf32>
    "tpu.trace_start"() <{level = 10 : i32, message = "bqk,bkd->bqd"}> : () -> ()
    %cst_52 = arith.constant dense<0.000000e+00> : vector<2x8x8xf32>
    %112 = tpu.matmul %111, %94, %cst_52 {dimension_numbers = #tpu.dot_dimension_numbers<[2], [1], [1], [2], [0, 0, 0, 1, 1, 2], [0], [0]>} : vector<2x8x8xf32>, vector<2x8x8xf32>, vector<2x8x8xf32> -> vector<2x8x8xf32>
    "tpu.trace_stop"() : () -> ()
    %113 = tpu.concatenate %48, %69, %90, %111 in 2 : vector<2x8x8xf32>, vector<2x8x8xf32>, vector<2x8x8xf32>, vector<2x8x8xf32> -> vector<2x8x32xf32>
    %c0_53 = arith.constant 0 : index
    %c0_54 = arith.constant 0 : index
    %c0_55 = arith.constant 0 : index
    %114 = vector.load %arg11[%c0_53, %c0_54, %c0_55] : memref<2x8x32xf32, #tpu.memory_space<vmem>>, vector<2x8x32xf32>
    tpu.vector_store %arg11[%c0_53, %c0_54, %c0_55], %113 {strides = array<i32>} : memref<2x8x32xf32, #tpu.memory_space<vmem>>, vector<2x8x32xf32>,
    %115 = tpu.concatenate %49, %70, %91, %112 in 2 : vector<2x8x8xf32>, vector<2x8x8xf32>, vector<2x8x8xf32>, vector<2x8x8xf32> -> vector<2x8x32xf32>
    %c0_56 = arith.constant 0 : index
    %c0_57 = arith.constant 0 : index
    %c0_58 = arith.constant 0 : index
    %116 = vector.load %arg12[%c0_56, %c0_57, %c0_58] : memref<2x8x32xf32, #tpu.memory_space<vmem>>, vector<2x8x32xf32>
    tpu.vector_store %arg12[%c0_56, %c0_57, %c0_58], %115 {strides = array<i32>} : memref<2x8x32xf32, #tpu.memory_space<vmem>>, vector<2x8x32xf32>,
    return
  }
  func.func @transform_0(%arg0: i32) -> (i32, i32, i32) {
    %c0_i32 = arith.constant 0 : i32
    %c0_i32_0 = arith.constant 0 : i32
    %c0_i32_1 = arith.constant 0 : i32
    return %arg0, %c0_i32, %c0_i32_0 : i32, i32, i32
  }
  func.func @transform_1(%arg0: i32) -> (i32, i32, i32) {
    %c0_i32 = arith.constant 0 : i32
    %c0_i32_0 = arith.constant 0 : i32
    %c0_i32_1 = arith.constant 0 : i32
    return %arg0, %c0_i32, %c0_i32_0 : i32, i32, i32
  }
  func.func @transform_2(%arg0: i32) -> (i32, i32, i32) {
    %c0_i32 = arith.constant 0 : i32
    %c0_i32_0 = arith.constant 0 : i32
    %c0_i32_1 = arith.constant 0 : i32
    return %arg0, %c0_i32, %c0_i32_0 : i32, i32, i32
  }
  func.func @transform_3(%arg0: i32) -> (i32, i32, i32) {
    %c0_i32 = arith.constant 0 : i32
    %c0_i32_0 = arith.constant 0 : i32
    %c0_i32_1 = arith.constant 0 : i32
    return %arg0, %c0_i32, %c0_i32_0 : i32, i32, i32
  }
  func.func @transform_4(%arg0: i32) -> (i32, i32) {
    %c0_i32 = arith.constant 0 : i32
    %c0_i32_0 = arith.constant 0 : i32
    %c0_i32_1 = arith.constant 0 : i32
    return %c0_i32, %c0_i32_0 : i32, i32
  }
  func.func @transform_5(%arg0: i32) -> (i32, i32) {
    %c0_i32 = arith.constant 0 : i32
    %c0_i32_0 = arith.constant 0 : i32
    %c0_i32_1 = arith.constant 0 : i32
    return %c0_i32, %c0_i32_0 : i32, i32
  }
  func.func @transform_6(%arg0: i32) -> (i32, i32) {
    %c0_i32 = arith.constant 0 : i32
    %c0_i32_0 = arith.constant 0 : i32
    %c0_i32_1 = arith.constant 0 : i32
    return %c0_i32, %c0_i32_0 : i32, i32
  }
  func.func @transform_7(%arg0: i32) -> (i32, i32) {
    %c0_i32 = arith.constant 0 : i32
    %c0_i32_0 = arith.constant 0 : i32
    %c0_i32_1 = arith.constant 0 : i32
    return %c0_i32, %c0_i32_0 : i32, i32
  }
  func.func @transform_8(%arg0: i32) -> (i32, i32) {
    %c0_i32 = arith.constant 0 : i32
    %c0_i32_0 = arith.constant 0 : i32
    %c0_i32_1 = arith.constant 0 : i32
    return %c0_i32, %c0_i32_0 : i32, i32
  }
  func.func @transform_9(%arg0: i32) -> (i32, i32) {
    %c0_i32 = arith.constant 0 : i32
    %c0_i32_0 = arith.constant 0 : i32
    %c0_i32_1 = arith.constant 0 : i32
    return %c0_i32, %c0_i32_0 : i32, i32
  }
  func.func @transform_10(%arg0: i32) -> (i32, i32, i32) {
    %c0_i32 = arith.constant 0 : i32
    %c0_i32_0 = arith.constant 0 : i32
    %c0_i32_1 = arith.constant 0 : i32
    return %arg0, %c0_i32, %c0_i32_0 : i32, i32, i32
  }
  func.func @transform_11(%arg0: i32) -> (i32, i32, i32) {
    %c0_i32 = arith.constant 0 : i32
    %c0_i32_0 = arith.constant 0 : i32
    %c0_i32_1 = arith.constant 0 : i32
    return %arg0, %c0_i32, %c0_i32_0 : i32, i32, i32
  }
}

</mosaic_0001>

<bundles_post_ra>
// kernel: tpu_custom_call.1
= control target key start
LH: loop header
LB: loop body
LE: loop exit
PB: predicated region body
PF: predicated region fallthrough
CT: control target
= control target key end

     0   :  { %17 = vsyncpa [#allocation3], 0  ;;  %s2650_s0 = inlined_call_operand.hbm [shape: f32[2,8,32], index: 0, kind: input, shape index: {}]   ;;  %s2651_s1 = inlined_call_operand.hbm [shape: f32[2,8,32], index: 1, kind: input, shape index: {}]   ;;  %s2652_s2 = inlined_call_operand.hbm [shape: f32[2,8,32], index: 2, kind: input, shape index: {}]   ;;  %s2653_s3 = inlined_call_operand.vmem [shape: s32[2,1,8], index: 3, kind: input, shape index: {}]   ;;  %s2654_s4 = inlined_call_operand.hbm [shape: f32[32,32], index: 4, kind: input, shape index: {}]   ;;  %s2655_s5 = inlined_call_operand.vmem [shape: f32[1,32], index: 5, kind: input, shape index: {}]   ;;  %s2656_s6 = inlined_call_operand.hbm [shape: f32[32,32], index: 6, kind: input, shape index: {}]   ;;  %s2657_s7 = inlined_call_operand.vmem [shape: f32[1,32], index: 7, kind: input, shape index: {}]   ;;  %s2658_s8 = inlined_call_operand.hbm [shape: f32[32,32], index: 8, kind: input, shape index: {}]   ;;  %s2659_s9 = inlined_call_operand.vmem [shape: f32[1,32], index: 9, kind: input, shape index: {}]   ;;  %s2660_s10 = inlined_call_operand.hbm [shape: f32[2,8,32], index: 10, kind: output, shape index: {0}]   ;;  %s2661_s11 = inlined_call_operand.hbm [shape: f32[2,8,32], index: 11, kind: output, shape index: {1}]  }
   0x1   :  { %18 = vsyncpa [#allocation6], 0 }
   0x2   :  { %19 = vsyncpa [#allocation9], 0 }
   0x3   :  { %20 = vsyncpa [#allocation12], 0 }
   0x4   :  { %21 = vsyncpa [#allocation4], 0 }
   0x5   :  { %22 = vsyncpa [#allocation15], 0  ;;  %s2271_s17 = smov [#allocation5]   ;;  %s2272_s19 = smov [#allocation8]  }
   0x6   :  { %s40_s18 = sshll.u32 %s2271_s17, 4  ;;  %s66_s20 = sshll.u32 %s2272_s19, 4  ;;  %s41_s18 = int_to_ptr.vmem [resolvable:$true] %s40_s18  ;;  %s67_s20 = int_to_ptr.vmem [resolvable:$true] %s66_s20 }
   0x7   :  { %s2107_s21 = scalar_lea.vmem %s41_s18, 256  ;;  %p2112_p1 = scmp.lt.s32.totalorder %s41_s18, %s41_s18 }
   0x8   :  { %p2108_p0 = scmp.ne.s32.totalorder %s41_s18, %s2107_s21  ;;  %p2113_p2 = scmp.lt.s32.totalorder %s2107_s21, %s2107_s21 }
   0xa   :  { %p2114_p3 = por %p2113_p2, %p2112_p1 }
   0xc   :  { %p2115_p4 = pnand %p2114_p3, %p2108_p0 }
   0xe   :  { %2118 = shalt.err (!%p2115_p4)
}
   0xf   :  { %s2273_s22 = smov 128   ;;  %s2274_s23 = smov 8  }
  0x10   :  { %46 = dma.hbm_to_vmem [thread:$0]  %s2651_s1, 256, %s41_s18, [#allocation6], %s2273_s22, %s2273_s22, %s2274_s23  }
  0x11   :  { %s2127_s26 = scalar_lea.vmem %s67_s20, 512  ;;  %p2132_p6 = scmp.lt.s32.totalorder %s67_s20, %s67_s20 }
  0x12   :  { %p2128_p5 = scmp.ne.s32.totalorder %s67_s20, %s2127_s26  ;;  %p2133_p7 = scmp.lt.s32.totalorder %s2127_s26, %s2127_s26 }
  0x14   :  { %p2134_p8 = por %p2133_p7, %p2132_p6 }
  0x16   :  { %p2135_p9 = pnand %p2134_p8, %p2128_p5 }
  0x18   :  { %2138 = shalt.err (!%p2135_p9)
}
  0x19   :  { %72 = dma.hbm_to_vmem [thread:$0]  %s2654_s4, 512, %s67_s20, [#allocation9], %s2273_s22, %s2273_s22, %s2274_s23  }
  0x1a   :  { %s2275_s29 = smov [#allocation2]   ;;  %s2276_s12 = smov [#allocation7]  }
  0x1b   :  { %s28_s30 = sshll.u32 %s2275_s29, 4  ;;  %s52_s13 = sshll.u32 %s2276_s12, 4  ;;  %s29_s30 = int_to_ptr.vmem [resolvable:$true] %s28_s30  ;;  %s53_s13 = int_to_ptr.vmem [resolvable:$true] %s52_s13 }
  0x1c   :  { %s2147_s1 = scalar_lea.vmem %s29_s30, 256  ;;  %p2152_p11 = scmp.lt.s32.totalorder %s29_s30, %s29_s30 }
  0x1d   :  { %p2148_p10 = scmp.ne.s32.totalorder %s29_s30, %s2147_s1  ;;  %p2153_p12 = scmp.lt.s32.totalorder %s2147_s1, %s2147_s1 }
  0x1f   :  { %p2154_p13 = por %p2153_p12, %p2152_p11 }
  0x21   :  { %p2155_p0 = pnand %p2154_p13, %p2148_p10 }
  0x23   :  { %2158 = shalt.err (!%p2155_p0)
}
  0x24   :  { %34 = dma.hbm_to_vmem [thread:$0]  %s2650_s0, 256, %s29_s30, [#allocation3], %s2273_s22, %s2273_s22, %s2274_s23  }
  0x25   :  { %s2167_s4 = scalar_lea.vmem %s53_s13, 256  ;;  %p2172_p2 = scmp.lt.s32.totalorder %s53_s13, %s53_s13 }
  0x26   :  { %p2168_p1 = scmp.ne.s32.totalorder %s53_s13, %s2167_s4  ;;  %p2173_p3 = scmp.lt.s32.totalorder %s2167_s4, %s2167_s4 }
  0x28   :  { %p2174_p4 = por %p2173_p3, %p2172_p2 }
  0x2a   :  { %p2175_p5 = pnand %p2174_p4, %p2168_p1 }
  0x2c   :  { %2178 = shalt.err (!%p2175_p5)
}
  0x2d   :  { %58 = dma.hbm_to_vmem [thread:$0]  %s2652_s2, 256, %s53_s13, [#allocation6], %s2273_s22, %s2273_s22, %s2274_s23  }
  0x2e   :  { %s2277_s18 = smov [#allocation10]   ;;  %s2278_s20 = smov [#allocation11]  }
  0x2f   :  { %s80_s19 = sshll.u32 %s2277_s18, 4  ;;  %s94_s21 = sshll.u32 %s2278_s20, 4  ;;  %s81_s19 = int_to_ptr.vmem [resolvable:$true] %s80_s19  ;;  %s95_s21 = int_to_ptr.vmem [resolvable:$true] %s94_s21 }
  0x30   :  { %s2187_s0 = scalar_lea.vmem %s81_s19, 512  ;;  %p2192_p7 = scmp.lt.s32.totalorder %s81_s19, %s81_s19 }
  0x31   :  { %p2188_p6 = scmp.ne.s32.totalorder %s81_s19, %s2187_s0  ;;  %p2193_p8 = scmp.lt.s32.totalorder %s2187_s0, %s2187_s0 }
  0x33   :  { %p2194_p9 = por %p2193_p8, %p2192_p7 }
  0x35   :  { %p2195_p10 = pnand %p2194_p9, %p2188_p6 }
  0x37   :  { %2198 = shalt.err (!%p2195_p10)
}
  0x38   :  { %86 = dma.hbm_to_vmem [thread:$0]  %s2656_s6, 512, %s81_s19, [#allocation9], %s2273_s22, %s2273_s22, %s2274_s23  }
  0x39   :  { %s2207_s2 = scalar_lea.vmem %s95_s21, 512  ;;  %p2212_p12 = scmp.lt.s32.totalorder %s95_s21, %s95_s21 }
  0x3a   :  { %p2208_p11 = scmp.ne.s32.totalorder %s95_s21, %s2207_s2  ;;  %p2213_p13 = scmp.lt.s32.totalorder %s2207_s2, %s2207_s2 }
  0x3c   :  { %p2214_p0 = por %p2213_p13, %p2212_p12 }
  0x3e   :  { %p2215_p1 = pnand %p2214_p0, %p2208_p11 }
  0x40   :  { %2218 = shalt.err (!%p2215_p1)
}
  0x41   :  { %100 = dma.hbm_to_vmem [thread:$0]  %s2658_s8, 512, %s95_s21, [#allocation12], %s2273_s22, %s2273_s22, %s2274_s23  }
  0x42   :  { %2259 = dma.done.wait [#allocation3], 256  }
  0x43   :  { %2260 = vsyncadd [#allocation3], 4294967040 }
  0x44   :  { %2261 = dma.done.wait [#allocation6], 512  }
  0x45   :  { %2262 = vsyncadd [#allocation6], 4294966784 }
  0x46   :  { %2263 = dma.done.wait [#allocation9], 1024  }
  0x47   :  { %2264 = vsyncadd [#allocation9], 4294966272 }
  0x48   :  { %2265 = dma.done.wait [#allocation12], 512  }
  0x49   :  { %2266 = vsyncadd [#allocation12], 4294966784  ;;  %v221_v0 = vld [vmem:[#allocation10 + $0x18] sm:$0xff]  ;;  %v220_v2 = vld [vmem:[#allocation10 + $0x10] sm:$0xff]  ;;  %vm134_vm0 = vcmask 261120   ;;  %v2279_v12 = vmov 0.0   ;;  %v410_v29 = vlaneseq }
  0x4a   :  { %v126_v1 = vld [vmem:[#allocation8 + $0x18] sm:$0xff]  ;;  %1947 = vmatprep.subr.mxu1 %v221_v0  ;;  %v125_v3 = vld [vmem:[#allocation8 + $0x10] sm:$0xff]  ;;  %v219_v4 = vld [vmem:[#allocation10 + $0x8] sm:$0xff]  ;;  %vm2280_vm1 = vmmov 0   ;;  %vm420_vm2 = vcmask 64512   ;;  %s2281_s30 = smov 120  }
  0x4b   :  { %1936 = vmatprep.subr.mxu0 %v126_v1  ;;  %1948 = vmatpush3.msra.mxu1 %v221_v0  ;;  %v124_v5 = vld [vmem:[#allocation8 + $0x8] sm:$0xff]  ;;  %v218_v6 = vld [vmem:[#allocation10] sm:$0xff]  ;;  %v121_v10 = vld [vmem:[#allocation2] sm:$0xff]  ;;  %v411_v31 = vshrl.u32 %v410_v29, 7  ;;  %v2282_v34 = vmov 0   ;;  %s2284_s14 = smov 104  }
  0x4c   :  { %1937 = vmatpush3.msra.mxu0 %v126_v1  ;;  %1949 = vmatprep.subr.mxu1 %v220_v2  ;;  %v216_v7 = vld [vmem:[#allocation5] sm:$0xff]  ;;  %v217_v9 = vld [vmem:[#allocation5 + $0x8] sm:$0xff]  ;;  %v122_v11 = vld [vmem:[#allocation2 + $0x8] sm:$0xff]  ;;  %s2285_s15 = smov 16   ;;  %s2286_s4 = smov 24   ;;  %vm1780_vm7 = vcmask 195584  }
  0x4d   :  { %1938 = vmatprep.subr.mxu0 %v125_v3  ;;  %1950 = vmatpush3.msra.mxu1 %v220_v2  ;;  %v123_v8 = vld [vmem:[#allocation8] sm:$0xff]  ;;  %v1856_v13 = vld [vmem:[%s2657_s7] ss:$0 sm:$0xff]  ;;  %v315_v23 = vld [vmem:[#allocation11 + $0x18] sm:$0xff]  ;;  %v412_v33 = vsub.s32 0, %v411_v31  ;;  %vm1777_vm8 = vcmask 130048  }
  0x4e   :  { %1939 = vmatpush3.msra.mxu0 %v125_v3  ;;  %1951 = vmatprep.subr.mxu1 %v219_v4  ;;  %v1853_v17 = vld [vmem:[%s2655_s5] ss:$0 sm:$0xff]  ;;  %v313_v26 = vld [vmem:[#allocation11 + $0x8] sm:$0xff]  ;;  %v312_v27 = vld [vmem:[#allocation11] sm:$0xff]  ;;  %s2287_s16 = smov [#allocation13]  }
  0x4f   :  { %1940 = vmatprep.subr.mxu0 %v124_v5  ;;  %1952 = vmatpush3.msra.mxu1 %v219_v4  ;;  %v314_v24 = vld [vmem:[#allocation11 + $0x10] sm:$0xff]  ;;  %v311_v28 = vld [vmem:[#allocation7 + $0x8] sm:$0xff]  ;;  %s1822_s17 = sshll.u32 %s2287_s16, 4  ;;  %s1823_s17 = int_to_ptr.vmem [resolvable:$true] %s1822_s17 }
  0x50   :  { %1941 = vmatpush3.msra.mxu0 %v124_v5  ;;  %1953 = vmatprep.subr.mxu1 %v218_v6  ;;  %v310_v25 = vld [vmem:[#allocation7] sm:$0xff]  ;;  %s2219_s18 = scalar_lea.vmem %s1823_s17, 256  ;;  %p2224_p3 = scmp.lt.s32.totalorder %s1823_s17, %s1823_s17 }
  0x51   :  { %1955 = vmatprep.mubr.msk.f32.mxu1 %vm134_vm0, %v216_v7  ;;  %1954 = vmatpush3.msra.mxu1 %v218_v6  ;;  %v404_v30 = vld [vmem:[%s2653_s3] sm:$0x1]  ;;  %v405_v32 = vld [vmem:[%s2653_s3 + $0x1] sm:$0x1]  ;;  %p2220_p2 = scmp.ne.s32.totalorder %s1823_s17, %s2219_s18  ;;  %p2225_p4 = scmp.lt.s32.totalorder %s2219_s18, %s2219_s18 }
  0x52   :  { %1942 = vmatprep.subr.mxu0 %v123_v8  ;;  %1956 = vmatmul.mubr.msk.f32.vlgmr.msra.gmra.mxu1 %vm134_vm0, %v217_v9  ;;  %vm406_vm3 = vcmp.eq.s32.totalorder %v404_v30, 0  ;;  %vm407_vm4 = vcmp.eq.s32.totalorder %v405_v32, 0  ;;  %v1859_v60 = vld [vmem:[%s2659_s9] ss:$0 sm:$0xff]  ;;  %s2283_s9 = smov 112  }
  0x53   :  { %1943 = vmatpush3.msra.mxu0 %v123_v8  ;;  %1944 = vmatprep.mubr.msk.f32.mxu0 %vm134_vm0, %v121_v10  ;;  %v408_v35 = vsel %vm406_vm3, 1, %v2282_v34  ;;  %v409_v37 = vsel %vm407_vm4, 1, %v2282_v34  ;;  %p2226_p5 = por %p2225_p4, %p2224_p3 }
  0x54   :  { %1945 = vmatmul.mubr.msk.f32.vlgmr.msra.gmra.mxu0 %vm134_vm0, %v122_v11  ;;  %1969 = vmatprep.subr.mxu1 %v2279_v12  ;;  %v2435_v36 = vrot.slane %v408_v35, %v412_v33  ;;  %v2438_v39 = vrot.slane %v409_v37, %v412_v33 }
  0x55   :  { %1971 = vmatprep.mubr.msk.f32.mxu1 %vm2280_vm1, %v2279_v12  ;;  %1958 = vmatprep.subr.mxu0 %v315_v23  ;;  %p2227_p6 = pnand %p2226_p5, %p2220_p2 }
  0x56   :  { %1959 = vmatpush3.msra.mxu0 %v315_v23  ;;  %1966 = vmatprep.mubr.msk.f32.mxu0 %vm134_vm0, %v310_v25  ;;  %vm418_vm5 = vcmp.eq.s32.totalorder %v2435_v36, 1  ;;  %vm419_vm6 = vcmp.eq.s32.totalorder %v2438_v39, 1 }
  0x57   :  { %1960 = vmatprep.subr.mxu0 %v314_v24 }
  0x58   :  { %1961 = vmatpush3.msra.mxu0 %v314_v24 }
  0x59   :  { %1962 = vmatprep.subr.mxu0 %v313_v26 }
  0x5a   :  { %1963 = vmatpush3.msra.mxu0 %v313_v26 }
  0x5b   :  { %1964 = vmatprep.subr.mxu0 %v312_v27 }
  0x5c   :  { %1965 = vmatpush3.msra.mxu0 %v312_v27 }
  0x5d   :  { %1967 = vmatmul.mubr.msk.f32.vlgmr.msra.gmra.mxu0 %vm134_vm0, %v311_v28  ;;  %1979 = vmatprep.subr.mxu0 %v2279_v12 }
  0x5e   :  { %1981 = vmatprep.mubr.msk.f32.mxu0 %vm2280_vm1, %v2279_v12 }
 0x112   :  { %v1957_v14 = vpop.f32.mrf.mxu1 }
 0x113   :  { %v2395_v15 = vadd.f32 %v1957_v14, %v1856_v13 }
 0x114   :  { %v1946_v16 = vpop.f32.mrf.mxu0  ;;  %v301_v18 = vpop.f32.mrf.mxu1 }
 0x115   :  { %v2400_v19 = vadd.f32 %v1856_v13, %v301_v18  ;;  %827 = vrot.lane.b32.xlu1 %v2395_v15, %s2281_s30  ;;  %v2417_v22 = vadd.f32 %v1946_v16, %v1853_v17 }
 0x116   :  { %v207_v20 = vpop.f32.mrf.mxu0 }
 0x117   :  { %v2404_v21 = vadd.f32 %v1853_v17, %v207_v20  ;;  %1970 = vmatpush3.xpose.msk.msra.mxu1 %vm420_vm2, %v2400_v19 }
 0x118   :  { %1974 = vmatprep.subr.mxu1 %v2279_v12 }
 0x119   :  { %747 = vrot.lane.b32.xlu1 %v2404_v21, %s2281_s30 }
 0x11a   :  { %1972 = vmatmul.mubr.msk.f32.vlgmr.msra.gmra.mxu1 %vm420_vm2, %v2404_v21 }
 0x11b   :  { %1975 = vmatpush3.xpose.msk.msra.mxu1 %vm420_vm2, %v2395_v15  ;;  %1976 = vmatprep.mubr.msk.f32.mxu1 %vm2280_vm1, %v2279_v12 }
 0x11c   :  { %1984 = vmatprep.subr.mxu1 %v2279_v12 }
 0x11d   :  { %v1968_v59 = vpop.f32.mrf.mxu0 }
 0x11e   :  { %1977 = vmatmul.mubr.msk.f32.vlgmr.msra.gmra.mxu1 %vm420_vm2, %v2417_v22  ;;  %v2454_v61 = vadd.f32 %v1968_v59, %v1859_v60 }
 0x11f   :  { %1986 = vmatprep.mubr.msk.f32.mxu1 %vm2280_vm1, %v2279_v12  ;;  %v395_v62 = vpop.f32.mrf.mxu0 }
 0x120   :  { %1985 = vmatpush3.msra.mxu1 %v2454_v61  ;;  %v2457_v63 = vadd.f32 %v1859_v60, %v395_v62 }
 0x121   :  { %1994 = vmatprep.subr.mxu1 %v2279_v12 }
 0x122   :  { %1980 = vmatpush3.msra.mxu0 %v2457_v63 }
 0x123   :  { %1989 = vmatprep.subr.mxu0 %v2279_v12 }
 0x187   :  { %v828_v0 = vpop.permute.xlu1 %827 }
 0x18b   :  { %v748_v1 = vpop.permute.xlu1 %747 }
 0x1da   :  { %v493_v38 = vpop.f32.mrf.mxu1 }
 0x1db   :  { %v573_v40 = vmul.f32 0.35355338, %v493_v38 }
 0x1dc   :  { %v1973_v41 = vpop.f32.mrf.mxu1 }
 0x1dd   :  { %v575_v42 = vsel %vm418_vm5, -3.4028235e+38, %v573_v40 }
 0x1de   :  { %v569_v43 = vpop.f32.mrf.mxu1  ;;  %v577_v44 = vsel %vm420_vm2, %v575_v42, -inf }
 0x1df   :  { %v574_v45 = vmul.f32 0.35355338, %v569_v43  ;;  %578 = vmax.xlane.f32.xlu0 %v577_v44 }
 0x1e0   :  { %v1978_v46 = vpop.f32.mrf.mxu1 }
 0x1e1   :  { %v576_v47 = vsel %vm419_vm6, -3.4028235e+38, %v574_v45 }
 0x1e2   :  { %v580_v48 = vsel %vm420_vm2, %v576_v47, -inf }
 0x1e3   :  { %581 = vmax.xlane.f32.xlu0 %v580_v48 }
 0x1f9   :  { %749 = vrot.lane.b32.xlu0 %v2400_v19, %s2281_s30 }
 0x268   :  { %v579_v49 = vpop.xlane.xlu0 %578 }
 0x269   :  { %v583_v50 = vsub.f32 %v575_v42, %v579_v49 }
 0x26b   :  { %v585_v51 = vmul.f32 1.442695, %v583_v50 }
 0x26c   :  { %v582_v52 = vpop.xlane.xlu0 %581 }
 0x26d   :  { %2067 = vpow2.f32 %v585_v51  ;;  %v584_v53 = vsub.f32 %v576_v47, %v582_v52 }
 0x26f   :  { %v587_v54 = vmul.f32 1.442695, %v584_v53 }
 0x270   :  { %v750_v8 = vpop.permute.xlu0 %749 }
 0x271   :  { %2069 = vpow2.f32 %v587_v54 }
 0x27a   :  { %v2068_v55 = vpop.eup %2067 }
 0x27b   :  { %v589_v56 = vsel %vm420_vm2, %v2068_v55, 0.0 }
 0x27c   :  { %590 = vadd.xlane.f32.xlu1 %v589_v56 }
 0x27e   :  { %v2070_v57 = vpop.eup %2069 }
 0x27f   :  { %v592_v58 = vsel %vm420_vm2, %v2070_v57, 0.0 }
 0x280   :  { %593 = vadd.xlane.f32.xlu1 %v592_v58 }
 0x291   :  { %825 = vrot.lane.b32.xlu1 %v2417_v22, %s2281_s30 }
 0x305   :  { %v591_v2 = vpop.xlane.xlu1 %590 }
 0x306   :  { %2071 = vrcp.f32 %v591_v2 }
 0x309   :  { %v594_v3 = vpop.xlane.xlu1 %593 }
 0x30a   :  { %2073 = vrcp.f32 %v594_v3 }
 0x30d   :  { %v826_v11 = vpop.permute.xlu1 %825 }
 0x313   :  { %v2072_v4 = vpop.eup %2071 }
 0x314   :  { %v597_v5 = vmul.f32 %v2072_v4, %v2068_v55 }
 0x316   :  { %v2466_v6 = vsel %vm418_vm5, 0.0, %v597_v5 }
 0x317   :  { %v2074_v7 = vpop.eup %2073  ;;  %1982 = vmatmul.mubr.msk.f32.vlgmr.msra.gmra.mxu0 %vm420_vm2, %v2466_v6 }
 0x318   :  { %1990 = vmatpush3.xpose.msk.msra.mxu0 %vm420_vm2, %v750_v8  ;;  %1991 = vmatprep.mubr.msk.f32.mxu0 %vm2280_vm1, %v2279_v12  ;;  %v598_v9 = vmul.f32 %v2074_v7, %v2070_v57 }
 0x319   :  { %1999 = vmatprep.subr.mxu0 %v2279_v12 }
 0x31a   :  { %v2476_v10 = vsel %vm419_vm6, 0.0, %v598_v9 }
 0x31b   :  { %1987 = vmatmul.mubr.msk.f32.vlgmr.msra.gmra.mxu1 %vm420_vm2, %v2476_v10  ;;  %1992 = vmatmul.mubr.msk.f32.vlgmr.msra.gmra.mxu0 %vm420_vm2, %v748_v1 }
 0x31c   :  { %1995 = vmatpush3.xpose.msk.msra.mxu1 %vm420_vm2, %v828_v0  ;;  %1996 = vmatprep.mubr.msk.f32.mxu1 %vm2280_vm1, %v2279_v12 }
 0x31d   :  { %2004 = vmatprep.subr.mxu1 %v2279_v12  ;;  %2001 = vmatprep.mubr.msk.f32.mxu0 %vm2280_vm1, %v2279_v12 }
 0x31f   :  { %1997 = vmatmul.mubr.msk.f32.vlgmr.msra.gmra.mxu1 %vm420_vm2, %v826_v11 }
 0x320   :  { %2006 = vmatprep.mubr.msk.f32.mxu1 %vm2280_vm1, %v2279_v12 }
 0x3d7   :  { %v2490_v13 = vpop.f32.mrf.mxu0 }
 0x3d9   :  { %v1983_v14 = vpop.f32.mrf.mxu0 }
 0x3db   :  { %v2492_v16 = vpop.f32.mrf.mxu1  ;;  %v821_v17 = vpop.f32.mrf.mxu0 }
 0x3dc   :  { %v903_v18 = vmul.f32 0.35355338, %v821_v17 }
 0x3dd   :  { %v1988_v20 = vpop.f32.mrf.mxu1  ;;  %v1993_v23 = vpop.f32.mrf.mxu0 }
 0x3de   :  { %v905_v24 = vsel %vm418_vm5, -3.4028235e+38, %v903_v18 }
 0x3df   :  { %v899_v25 = vpop.f32.mrf.mxu1  ;;  %v907_v26 = vsel %vm420_vm2, %v905_v24, -inf }
 0x3e0   :  { %v904_v27 = vmul.f32 0.35355338, %v899_v25  ;;  %908 = vmax.xlane.f32.xlu0 %v907_v26 }
 0x3e1   :  { %v1998_v28 = vpop.f32.mrf.mxu1 }
 0x3e2   :  { %v906_v29 = vsel %vm419_vm6, -3.4028235e+38, %v904_v27 }
 0x3e3   :  { %v910_v30 = vsel %vm420_vm2, %v906_v29, -inf }
 0x3e4   :  { %911 = vmax.xlane.f32.xlu1 %v910_v30 }
 0x3f5   :  { %1009 = vrot.lane.b32.xlu1 %v2454_v61, %s2281_s30 }
 0x3f9   :  { %1087 = vrot.lane.b32.xlu1 %v2400_v19, %s2283_s9 }
 0x3fd   :  { %1165 = vrot.lane.b32.xlu1 %v2395_v15, %s2283_s9 }
 0x401   :  { %1163 = vrot.lane.b32.xlu1 %v2417_v22, %s2283_s9 }
 0x469   :  { %v909_v31 = vpop.xlane.xlu0 %908 }
 0x46a   :  { %v913_v32 = vsub.f32 %v905_v24, %v909_v31 }
 0x46c   :  { %v915_v33 = vmul.f32 1.442695, %v913_v32 }
 0x46d   :  { %v912_v34 = vpop.xlane.xlu1 %911 }
 0x46e   :  { %2075 = vpow2.f32 %v915_v33  ;;  %v914_v35 = vsub.f32 %v906_v29, %v912_v34 }
 0x470   :  { %v917_v37 = vmul.f32 1.442695, %v914_v35 }
 0x471   :  { %v1010_v38 = vpop.permute.xlu1 %1009 }
 0x472   :  { %2077 = vpow2.f32 %v917_v37  ;;  %2005 = vmatpush3.msra.mxu1 %v1010_v38 }
 0x473   :  { %2014 = vmatprep.subr.mxu1 %v2279_v12 }
 0x475   :  { %v1088_v47 = vpop.permute.xlu1 %1087 }
 0x479   :  { %v1166_v52 = vpop.permute.xlu1 %1165 }
 0x47b   :  { %v2076_v40 = vpop.eup %2075 }
 0x47c   :  { %v919_v41 = vsel %vm420_vm2, %v2076_v40, 0.0 }
 0x47d   :  { %920 = vadd.xlane.f32.xlu0 %v919_v41  ;;  %v1164_v56 = vpop.permute.xlu1 %1163 }
 0x47f   :  { %v2078_v42 = vpop.eup %2077 }
 0x480   :  { %v922_v43 = vsel %vm420_vm2, %v2078_v42, 0.0 }
 0x481   :  { %923 = vadd.xlane.f32.xlu0 %v922_v43 }
 0x497   :  { %932 = vrot.lane.b32.xlu0 %v2457_v63, %s2281_s30 }
 0x49b   :  { %1085 = vrot.lane.b32.xlu0 %v2404_v21, %s2283_s9 }
 0x506   :  { %v921_v44 = vpop.xlane.xlu0 %920 }
 0x507   :  { %2079 = vrcp.f32 %v921_v44 }
 0x50a   :  { %v924_v45 = vpop.xlane.xlu0 %923 }
 0x50b   :  { %2081 = vrcp.f32 %v924_v45 }
 0x50e   :  { %v933_v46 = vpop.permute.xlu0 %932 }
 0x50f   :  { %2000 = vmatpush3.msra.mxu0 %v933_v46 }
 0x510   :  { %2009 = vmatprep.subr.mxu0 %v2279_v12 }
 0x512   :  { %v1086_v54 = vpop.permute.xlu0 %1085 }
 0x514   :  { %v2080_v48 = vpop.eup %2079 }
 0x515   :  { %v927_v49 = vmul.f32 %v2080_v48, %v2076_v40 }
 0x517   :  { %v2518_v50 = vsel %vm418_vm5, 0.0, %v927_v49 }
 0x518   :  { %v2082_v51 = vpop.eup %2081  ;;  %2002 = vmatmul.mubr.msk.f32.vlgmr.msra.gmra.mxu0 %vm420_vm2, %v2518_v50 }
 0x519   :  { %2010 = vmatpush3.xpose.msk.msra.mxu0 %vm420_vm2, %v1088_v47  ;;  %2011 = vmatprep.mubr.msk.f32.mxu0 %vm2280_vm1, %v2279_v12  ;;  %v928_v53 = vmul.f32 %v2082_v51, %v2078_v42 }
 0x51a   :  { %2019 = vmatprep.subr.mxu0 %v2279_v12 }
 0x51b   :  { %v2528_v55 = vsel %vm419_vm6, 0.0, %v928_v53 }
 0x51c   :  { %2007 = vmatmul.mubr.msk.f32.vlgmr.msra.gmra.mxu1 %vm420_vm2, %v2528_v55  ;;  %2012 = vmatmul.mubr.msk.f32.vlgmr.msra.gmra.mxu0 %vm420_vm2, %v1086_v54 }
 0x51d   :  { %2015 = vmatpush3.xpose.msk.msra.mxu1 %vm420_vm2, %v1166_v52  ;;  %2016 = vmatprep.mubr.msk.f32.mxu1 %vm2280_vm1, %v2279_v12 }
 0x51e   :  { %2024 = vmatprep.subr.mxu1 %v2279_v12  ;;  %2021 = vmatprep.mubr.msk.f32.mxu0 %vm2280_vm1, %v2279_v12 }
 0x520   :  { %2017 = vmatmul.mubr.msk.f32.vlgmr.msra.gmra.mxu1 %vm420_vm2, %v1164_v56 }
 0x521   :  { %2026 = vmatprep.mubr.msk.f32.mxu1 %vm2280_vm1, %v2279_v12 }
 0x5d8   :  { %v2542_v57 = vpop.f32.mrf.mxu0 }
 0x5da   :  { %v2003_v58 = vpop.f32.mrf.mxu0 }
 0x5dc   :  { %v2544_v59 = vpop.f32.mrf.mxu1  ;;  %v1159_v60 = vpop.f32.mrf.mxu0 }
 0x5dd   :  { %v1241_v62 = vmul.f32 0.35355338, %v1159_v60 }
 0x5de   :  { %v2008_v0 = vpop.f32.mrf.mxu1  ;;  %v2013_v1 = vpop.f32.mrf.mxu0 }
 0x5df   :  { %v1243_v2 = vsel %vm418_vm5, -3.4028235e+38, %v1241_v62 }
 0x5e0   :  { %v1237_v3 = vpop.f32.mrf.mxu1  ;;  %v1245_v4 = vsel %vm420_vm2, %v1243_v2, -inf }
 0x5e1   :  { %v1242_v5 = vmul.f32 0.35355338, %v1237_v3  ;;  %1246 = vmax.xlane.f32.xlu0 %v1245_v4 }
 0x5e2   :  { %v2018_v7 = vpop.f32.mrf.mxu1 }
 0x5e3   :  { %v1244_v8 = vsel %vm419_vm6, -3.4028235e+38, %v1242_v5 }
 0x5e4   :  { %v1248_v9 = vsel %vm420_vm2, %v1244_v8, -inf }
 0x5e5   :  { %1249 = vmax.xlane.f32.xlu1 %v1248_v9 }
 0x5f6   :  { %1345 = vrot.lane.b32.xlu1 %v2454_v61, %s2283_s9 }
 0x5fa   :  { %1423 = vrot.lane.b32.xlu1 %v2400_v19, %s2284_s14 }
 0x5fe   :  { %1501 = vrot.lane.b32.xlu1 %v2395_v15, %s2284_s14 }
 0x602   :  { %1499 = vrot.lane.b32.xlu1 %v2417_v22, %s2284_s14 }
 0x66a   :  { %v1247_v11 = vpop.xlane.xlu0 %1246 }
 0x66b   :  { %v1251_v14 = vsub.f32 %v1243_v2, %v1247_v11 }
 0x66d   :  { %v1253_v17 = vmul.f32 1.442695, %v1251_v14 }
 0x66e   :  { %v1250_v18 = vpop.xlane.xlu1 %1249 }
 0x66f   :  { %2083 = vpow2.f32 %v1253_v17  ;;  %v1252_v20 = vsub.f32 %v1244_v8, %v1250_v18 }
 0x671   :  { %v1255_v23 = vmul.f32 1.442695, %v1252_v20 }
 0x672   :  { %v1346_v24 = vpop.permute.xlu1 %1345 }
 0x673   :  { %2085 = vpow2.f32 %v1255_v23  ;;  %2025 = vmatpush3.msra.mxu1 %v1346_v24 }
 0x674   :  { %2034 = vmatprep.subr.mxu1 %v2279_v12 }
 0x676   :  { %v1424_v29 = vpop.permute.xlu1 %1423 }
 0x67a   :  { %v1502_v34 = vpop.permute.xlu1 %1501 }
 0x67c   :  { %v2084_v25 = vpop.eup %2083 }
 0x67d   :  { %v1257_v19 = vsel %vm420_vm2, %v2084_v25, 0.0 }
 0x67e   :  { %1258 = vadd.xlane.f32.xlu0 %v1257_v19  ;;  %v1500_v38 = vpop.permute.xlu1 %1499 }
 0x680   :  { %v2086_v15 = vpop.eup %2085 }
 0x681   :  { %v1260_v26 = vsel %vm420_vm2, %v2086_v15, 0.0 }
 0x682   :  { %1261 = vadd.xlane.f32.xlu0 %v1260_v26 }
 0x698   :  { %1269 = vrot.lane.b32.xlu0 %v2457_v63, %s2283_s9 }
 0x69c   :  { %1421 = vrot.lane.b32.xlu0 %v2404_v21, %s2284_s14 }
 0x707   :  { %v1259_v22 = vpop.xlane.xlu0 %1258 }
 0x708   :  { %2087 = vrcp.f32 %v1259_v22 }
 0x70b   :  { %v1262_v27 = vpop.xlane.xlu0 %1261 }
 0x70c   :  { %2089 = vrcp.f32 %v1262_v27 }
 0x70f   :  { %v1270_v28 = vpop.permute.xlu0 %1269 }
 0x710   :  { %2020 = vmatpush3.msra.mxu0 %v1270_v28 }
 0x711   :  { %2029 = vmatprep.subr.mxu0 %v2279_v12 }
 0x713   :  { %v1422_v35 = vpop.permute.xlu0 %1421 }
 0x715   :  { %v2088_v30 = vpop.eup %2087 }
 0x716   :  { %v1265_v31 = vmul.f32 %v2088_v30, %v2084_v25 }
 0x718   :  { %v1267_v32 = vsel %vm418_vm5, 0.0, %v1265_v31 }
 0x719   :  { %v2090_v33 = vpop.eup %2089  ;;  %2022 = vmatmul.mubr.msk.f32.vlgmr.msra.gmra.mxu0 %vm420_vm2, %v1267_v32 }
 0x71a   :  { %2030 = vmatpush3.xpose.msk.msra.mxu0 %vm420_vm2, %v1424_v29  ;;  %2031 = vmatprep.mubr.msk.f32.mxu0 %vm2280_vm1, %v2279_v12  ;;  %v1266_v21 = vmul.f32 %v2090_v33, %v2086_v15 }
 0x71b   :  { %2039 = vmatprep.subr.mxu0 %v2279_v12 }
 0x71c   :  { %v1268_v37 = vsel %vm419_vm6, 0.0, %v1266_v21 }
 0x71d   :  { %2027 = vmatmul.mubr.msk.f32.vlgmr.msra.gmra.mxu1 %vm420_vm2, %v1268_v37  ;;  %2032 = vmatmul.mubr.msk.f32.vlgmr.msra.gmra.mxu0 %vm420_vm2, %v1422_v35 }
 0x71e   :  { %2035 = vmatpush3.xpose.msk.msra.mxu1 %vm420_vm2, %v1502_v34  ;;  %2036 = vmatprep.mubr.msk.f32.mxu1 %vm2280_vm1, %v2279_v12 }
 0x71f   :  { %2044 = vmatprep.subr.mxu1 %v2279_v12  ;;  %2041 = vmatprep.mubr.msk.f32.mxu0 %vm2280_vm1, %v2279_v12 }
 0x721   :  { %2037 = vmatmul.mubr.msk.f32.vlgmr.msra.gmra.mxu1 %vm420_vm2, %v1500_v38 }
 0x722   :  { %2046 = vmatprep.mubr.msk.f32.mxu1 %vm2280_vm1, %v2279_v12 }
 0x7d9   :  { %v1341_v40 = vpop.f32.mrf.mxu0 }
 0x7db   :  { %v2023_v41 = vpop.f32.mrf.mxu0 }
 0x7dd   :  { %v1417_v42 = vpop.f32.mrf.mxu1  ;;  %v1495_v43 = vpop.f32.mrf.mxu0 }
 0x7de   :  { %v1577_v44 = vmul.f32 0.35355338, %v1495_v43 }
 0x7df   :  { %v2028_v45 = vpop.f32.mrf.mxu1  ;;  %v2033_v46 = vpop.f32.mrf.mxu0 }
 0x7e0   :  { %v1579_v47 = vsel %vm418_vm5, -3.4028235e+38, %v1577_v44 }
 0x7e1   :  { %v1573_v48 = vpop.f32.mrf.mxu1  ;;  %v1581_v49 = vsel %vm420_vm2, %v1579_v47, -inf }
 0x7e2   :  { %v1578_v51 = vmul.f32 0.35355338, %v1573_v48  ;;  %1582 = vmax.xlane.f32.xlu0 %v1581_v49 }
 0x7e3   :  { %v2038_v52 = vpop.f32.mrf.mxu1 }
 0x7e4   :  { %v1580_v53 = vsel %vm419_vm6, -3.4028235e+38, %v1578_v51 }
 0x7e5   :  { %v1584_v12 = vsel %vm420_vm2, %v1580_v53, -inf }
 0x7e6   :  { %1585 = vmax.xlane.f32.xlu1 %v1584_v12 }
 0x7f7   :  { %1681 = vrot.lane.b32.xlu1 %v2454_v61, %s2284_s14 }
 0x7fb   :  { %1757 = vrot.lane.b32.xlu1 %v2518_v50, %s2274_s23 }
 0x7ff   :  { %1759 = vrot.lane.b32.xlu1 %v2528_v55, %s2274_s23 }
 0x803   :  { %1789 = vrot.lane.b32.xlu1 %v2544_v59, %s2274_s23 }
 0x807   :  { %1765 = vrot.lane.b32.xlu1 %v1268_v37, %s2285_s15 }
 0x80b   :  { %1797 = vrot.lane.b32.xlu1 %v1417_v42, %s2285_s15 }
 0x86b   :  { %v1583_v54 = vpop.xlane.xlu0 %1582 }
 0x86c   :  { %v1587_v56 = vsub.f32 %v1579_v47, %v1583_v54 }
 0x86e   :  { %v1589_v58 = vmul.f32 1.442695, %v1587_v56 }
 0x86f   :  { %v1586_v60 = vpop.xlane.xlu1 %1585 }
 0x870   :  { %2091 = vpow2.f32 %v1589_v58  ;;  %v1588_v62 = vsub.f32 %v1580_v53, %v1586_v60 }
 0x872   :  { %v1591_v0 = vmul.f32 1.442695, %v1588_v62 }
 0x873   :  { %v1682_v61 = vpop.permute.xlu1 %1681 }
 0x874   :  { %2093 = vpow2.f32 %v1591_v0  ;;  %2045 = vmatpush3.msra.mxu1 %v1682_v61 }
 0x877   :  { %v1758_v11 = vpop.permute.xlu1 %1757 }
 0x878   :  { %v1775_v24 = vsel %vm420_vm2, %v2466_v6, %v1758_v11 }
 0x87b   :  { %v1760_v14 = vpop.permute.xlu1 %1759 }
 0x87c   :  { %v1776_v26 = vsel %vm420_vm2, %v2476_v10, %v1760_v14 }
 0x87d   :  { %v2092_v50 = vpop.eup %2091 }
 0x87e   :  { %v1593_v1 = vsel %vm420_vm2, %v2092_v50, 0.0 }
 0x87f   :  { %1594 = vadd.xlane.f32.xlu0 %v1593_v1  ;;  %v1790_v18 = vpop.permute.xlu1 %1789 }
 0x881   :  { %v2094_v55 = vpop.eup %2093 }
 0x882   :  { %v1596_v59 = vsel %vm420_vm2, %v2094_v55, 0.0 }
 0x883   :  { %1597 = vadd.xlane.f32.xlu0 %v1596_v59  ;;  %v1766_v20 = vpop.permute.xlu1 %1765 }
 0x884   :  { %v1779_v22 = vsel %vm1777_vm8, %v1776_v26, %v1766_v20 }
 0x887   :  { %v1798_v25 = vpop.permute.xlu1 %1797 }
 0x899   :  { %1605 = vrot.lane.b32.xlu0 %v2457_v63, %s2284_s14 }
 0x89d   :  { %1787 = vrot.lane.b32.xlu0 %v2542_v57, %s2274_s23 }
 0x8a1   :  { %1763 = vrot.lane.b32.xlu0 %v1267_v32, %s2285_s15 }
 0x8a5   :  { %1795 = vrot.lane.b32.xlu0 %v1341_v40, %s2285_s15 }
 0x908   :  { %v1595_v2 = vpop.xlane.xlu0 %1594 }
 0x909   :  { %2095 = vrcp.f32 %v1595_v2 }
 0x90c   :  { %v1598_v3 = vpop.xlane.xlu0 %1597 }
 0x90d   :  { %2097 = vrcp.f32 %v1598_v3 }
 0x910   :  { %v1606_v4 = vpop.permute.xlu0 %1605 }
 0x911   :  { %2040 = vmatpush3.msra.mxu0 %v1606_v4 }
 0x914   :  { %v1788_v17 = vpop.permute.xlu0 %1787 }
 0x916   :  { %v2096_v5 = vpop.eup %2095 }
 0x917   :  { %v1601_v7 = vmul.f32 %v2096_v5, %v2092_v50 }
 0x918   :  { %v1764_v36 = vpop.permute.xlu0 %1763 }
 0x919   :  { %v1603_v8 = vsel %vm418_vm5, 0.0, %v1601_v7  ;;  %v1778_v39 = vsel %vm1777_vm8, %v1775_v24, %v1764_v36 }
 0x91a   :  { %v2098_v9 = vpop.eup %2097  ;;  %1769 = vrot.lane.b32.xlu0 %v1603_v8, %s2286_s4  ;;  %2042 = vmatmul.mubr.msk.f32.vlgmr.msra.gmra.mxu0 %vm420_vm2, %v1603_v8 }
 0x91b   :  { %v1602_v63 = vmul.f32 %v2098_v9, %v2094_v55 }
 0x91c   :  { %v1796_v23 = vpop.permute.xlu0 %1795 }
 0x91d   :  { %v1604_v57 = vsel %vm419_vm6, 0.0, %v1602_v63 }
 0x91e   :  { %1771 = vrot.lane.b32.xlu1 %v1604_v57, %s2286_s4  ;;  %2047 = vmatmul.mubr.msk.f32.vlgmr.msra.gmra.mxu1 %vm420_vm2, %v1604_v57 }
 0x98c   :  { %v1770_v19 = vpop.permute.xlu0 %1769 }
 0x98d   :  { %v1781_v15 = vsel %vm1780_vm7, %v1778_v39, %v1770_v19 }
 0x98e   :  { %1783 = vst.msk [vmem:[#allocation13] sm:$0xff] %vm134_vm0, %v1781_v15 }
 0x990   :  { %v1772_v27 = vpop.permute.xlu1 %1771 }
 0x991   :  { %v1782_v28 = vsel %vm1780_vm7, %v1779_v22, %v1772_v27 }
 0x992   :  { %1784 = vst.msk [vmem:[#allocation13 + $0x8] sm:$0xff] %vm134_vm0, %v1782_v28 }
 0x993   :  { %2230 = shalt.err (!%p2227_p6)
}
 0x994   :  { %1828 = dma.vmem_to_hbm [thread:$0]  %s1823_s17, 256, %s2660_s10, [#allocation4], %s2273_s22, %s2273_s22, %s2274_s23   ;;  %v1809_v31 = vsel %vm420_vm2, %v2490_v13, %v1788_v17  ;;  %v1810_v21 = vsel %vm420_vm2, %v2492_v16, %v1790_v18 }
 0x995   :  { %v1811_v32 = vsel %vm1777_vm8, %v1809_v31, %v1796_v23  ;;  %s2288_s21 = smov [#allocation14]   ;;  %v1812_v35 = vsel %vm1777_vm8, %v1810_v21, %v1798_v25 }
 0x996   :  { %s1834_s0 = sshll.u32 %s2288_s21, 4  ;;  %s1835_s0 = int_to_ptr.vmem [resolvable:$true] %s1834_s0 }
 0x997   :  { %s2239_s10 = scalar_lea.vmem %s1835_s0, 256  ;;  %p2244_p8 = scmp.lt.s32.totalorder %s1835_s0, %s1835_s0 }
 0x998   :  { %p2240_p7 = scmp.ne.s32.totalorder %s1835_s0, %s2239_s10  ;;  %p2245_p9 = scmp.lt.s32.totalorder %s2239_s10, %s2239_s10 }
 0x99a   :  { %p2246_p10 = por %p2245_p9, %p2244_p8 }
 0x99c   :  { %p2247_p11 = pnand %p2246_p10, %p2240_p7 }
 0x9da   :  { %v1677_v6 = vpop.f32.mrf.mxu0 }
 0x9db   :  { %1803 = vrot.lane.b32.xlu0 %v1677_v6, %s2286_s4 }
 0x9dc   :  { %v2043_v10 = vpop.f32.mrf.mxu0 }
 0x9de   :  { %v1753_v29 = vpop.f32.mrf.mxu1 }
 0x9df   :  { %1805 = vrot.lane.b32.xlu1 %v1753_v29, %s2286_s4 }
 0x9e0   :  { %v2048_v30 = vpop.f32.mrf.mxu1 }
 0xa4d   :  { %v1804_v33 = vpop.permute.xlu0 %1803 }
 0xa4e   :  { %v1813_v34 = vsel %vm1780_vm7, %v1811_v32, %v1804_v33 }
 0xa4f   :  { %1815 = vst.msk [vmem:[#allocation14] sm:$0xff] %vm134_vm0, %v1813_v34 }
 0xa51   :  { %v1806_v37 = vpop.permute.xlu1 %1805 }
 0xa52   :  { %v1814_v38 = vsel %vm1780_vm7, %v1812_v35, %v1806_v37 }
 0xa53   :  { %1816 = vst.msk [vmem:[#allocation14 + $0x8] sm:$0xff] %vm134_vm0, %v1814_v38 }
 0xa54   :  { %2250 = shalt.err (!%p2247_p11)
}
 0xa55   :  { %1840 = dma.vmem_to_hbm [thread:$0]  %s1835_s0, 256, %s2661_s11, [#allocation15], %s2273_s22, %s2273_s22, %s2274_s23  }
 0xa56   :  { %2267 = dma.done.wait [#allocation4], 256  }
 0xa57   :  { %2268 = vsyncadd [#allocation4], 4294967040 }
 0xa58   :  { %2269 = dma.done.wait [#allocation15], 256  }
 0xa59   :  { %2270 = vsyncadd [#allocation15], 4294967040 }
 0xa5a   :  { %1847 = vsyncpa [#allocation3], 1 }
 0xa5b   :  { %1848 = vsyncpa [#allocation6], 1 }
 0xa5c   :  { %1849 = vsyncpa [#allocation9], 1 }
 0xa5d   :  { %1850 = vsyncpa [#allocation12], 1 }
 0xa5e   :  { %1851 = vsyncpa [#allocation4], 1 }
 0xa5f   :  { %1852 = vsyncpa [#allocation15], 1 }

</bundles_post_ra>
